<compile_context>
chip_gen: v7x
topology: tpu7x:2x2x1
jax: 0.10.0
libtpu: 0.0.40
codegen_flags: <defaults>
</compile_context>

<pallas_src>
import math
from functools import partial

import jax
import jax.numpy as jnp
from jax.experimental import pallas as pl
from jax.experimental.pallas import tpu as pltpu


# ----------------------------- Pallas kernel ------------------------------ #
def _gnn2layer_kernel(a_ref, x_ref, nrm_ref,
                      w1_ref, b1_ref, w2_ref, b2_ref,
                      wf1_ref, bf1_ref, wf2_ref, bf2_ref, wf3_ref, bf3_ref,
                      out_ref, *, P, N):
    PN = P * N
    a = a_ref[...].astype(jnp.float32)        # (GB, PN, PN) block-diag {0,1}, bf16->f32
    x = x_ref[...]                            # (GB, PN, Fin)
    nrm = nrm_ref[...]                        # (GB, PN, 2)  [norm_src, norm_dst]
    GB = a.shape[0]
    fin = x.shape[-1]
    nsrc = nrm[..., 0:1]                      # (GB, PN, 1)
    ndst = nrm[..., 1:2]                      # (GB, PN, 1)

    # ---- GraphConv layer 1: aggregate (narrow Fin) first, then transform ----
    agg = jnp.einsum('gij,gjf->gif', a, x * nsrc,
                     preferred_element_type=jnp.float32)        # (GB, PN, Fin)
    agg = (agg * ndst).reshape(GB * PN, fin)
    h = jnp.dot(agg, w1_ref[...], preferred_element_type=jnp.float32) + b1_ref[...]
    h = jnp.maximum(h, 0.0)                                     # (GB*PN, h1)
    h1 = h.shape[-1]

    # ---- GraphConv layer 2 ----
    agg = jnp.einsum('gij,gjf->gif', a, h.reshape(GB, PN, h1) * nsrc,
                     preferred_element_type=jnp.float32)        # (GB, PN, h1)
    agg = (agg * ndst).reshape(GB * PN, h1)
    h = jnp.dot(agg, w2_ref[...], preferred_element_type=jnp.float32) + b2_ref[...]
    h = jnp.maximum(h, 0.0)                                     # (GB*PN, h2)
    h2 = h.shape[-1]

    # ---- dgl.sum_nodes readout: per-graph sum over each graph's N nodes ----
    hg = jnp.sum(h.reshape(GB * P, N, h2), axis=1)              # (G, h2)

    # ---- MLP head, batched over all G graphs of this step ----
    z = jnp.maximum(jnp.dot(hg, wf1_ref[...],
                            preferred_element_type=jnp.float32) + bf1_ref[...], 0.0)
    z = jnp.maximum(jnp.dot(z, wf2_ref[...],
                            preferred_element_type=jnp.float32) + bf2_ref[...], 0.0)
    z = jnp.dot(z, wf3_ref[...], preferred_element_type=jnp.float32) + bf3_ref[...]

    out_ref[...] = z.astype(out_ref.dtype)    # (G, out_pad) lane-dense store


# ------------------------------- Wrapper ----------------------------------- #
def model_nn2layer_forward(A, X, params, *, graphs_per_block=8, graphs_per_step=256):
    """A: (B, N, N) dense adjacency with self-loops, X: (B, N, Fin) node features.

    graphs_per_block: graphs packed into one block-diagonal MXU matmul
                      (8 -> 128-wide for N=16; use 16 on v6e/v7x for 256-wide).
    graphs_per_step:  graphs processed per grid step (VMEM/pipelining tile knob).
    """
    B, N, _ = A.shape
    Fin = X.shape[-1]
    w1, b1, w2, b2, wf1, bf1, wf2, bf2, wf3, bf3 = params
    h1, h2 = w1.shape[1], w2.shape[1]
    fc1, fc2, outclass = wf1.shape[1], wf2.shape[1], wf3.shape[1]

    P = graphs_per_block
    PN = P * N
    assert PN % 8 == 0, "graphs_per_block * nodes must be sublane-aligned"

    # --- batch tiling: GB graph-blocks (of P graphs each) per grid step -----
    GB = min(max(graphs_per_step // P, 1), pl.cdiv(B, P))
    G = GB * P                       # graphs per grid step (multiple of 8)
    num_steps = pl.cdiv(B, G)
    Bp = num_steps * G
    if Bp != B:
        pad = Bp - B
        A = jnp.pad(A, ((0, pad), (0, 0), (0, 0)))
        X = jnp.pad(X, ((0, pad), (0, 0), (0, 0)))
    NB = Bp // P                     # total graph-blocks (= num_steps * GB)

    # --- GraphConv norms precomputed outside the kernel (frees XLU/EUP) -----
    deg_dst = jnp.sum(A, axis=-1)                        # in-degree per dst row
    deg_src = jnp.sum(A, axis=-2)                        # out-degree per src col
    norm_dst = jax.lax.rsqrt(jnp.maximum(deg_dst, 1.0))
    norm_src = jax.lax.rsqrt(jnp.maximum(deg_src, 1.0))
    normsb = jnp.stack([norm_src, norm_dst], axis=-1).reshape(NB, PN, 2)

    # --- block-diagonal {0,1} adjacency, stored bf16 (exact, halves HBM) ----
    eyeP = jnp.eye(P, dtype=jnp.bfloat16)
    Ag = A.astype(jnp.bfloat16).reshape(NB, P, N, N)
    Ablk = (Ag[:, :, :, None, :] * eyeP[None, :, None, :, None]).reshape(NB, PN, PN)

    Xb = X.reshape(NB, PN, Fin)

    # --- lane-dense output: pad fc3 to a full 128-lane store ----------------
    out_pad = 128 * pl.cdiv(outclass, 128)
    wf3p = jnp.zeros((fc2, out_pad), wf3.dtype).at[:, :outclass].set(wf3)
    bf3p = jnp.zeros((1, out_pad), bf3.dtype).at[:, :outclass].set(bf3)

    full2d = lambda arr: pl.BlockSpec(arr.shape, lambda s: (0, 0))

    # Advisory cost estimate for the XLA scheduler.
    flops = int(2 * NB * PN * PN * (Fin + h1)                 # block-diag aggregations
                + 2 * Bp * N * (Fin * h1 + h1 * h2)           # feature transforms
                + 2 * Bp * (h2 * fc1 + fc1 * fc2 + fc2 * out_pad))
    weight_bytes = 4 * (w1.size + b1.size + w2.size + b2.size + wf1.size + bf1.size
                        + wf2.size + bf2.size + wf3p.size + bf3p.size)
    cost = pl.CostEstimate(
        flops=flops, transcendentals=0,
        bytes_accessed=int(2 * Ablk.size + 4 * (Xb.size + normsb.size + Bp * out_pad)
                           + weight_bytes))

    kernel = partial(_gnn2layer_kernel, P=P, N=N)

    out = pl.pallas_call(
        kernel,
        out_shape=jax.ShapeDtypeStruct((Bp, out_pad), jnp.float32),
        grid=(num_steps,),
        in_specs=[
            pl.BlockSpec((GB, PN, PN), lambda s: (s, 0, 0)),    # block-diag A (bf16)
            pl.BlockSpec((GB, PN, Fin), lambda s: (s, 0, 0)),   # node features
            pl.BlockSpec((GB, PN, 2), lambda s: (s, 0, 0)),     # (norm_src, norm_dst)
            full2d(w1), full2d(b1), full2d(w2), full2d(b2),
            full2d(wf1), full2d(bf1), full2d(wf2), full2d(bf2),
            full2d(wf3p), full2d(bf3p),
        ],
        out_specs=pl.BlockSpec((G, out_pad), lambda s: (s, 0)),
        compiler_params=pltpu.CompilerParams(
            dimension_semantics=("parallel",),
            vmem_limit_bytes=48 * 1024 * 1024),
        cost_estimate=cost,
    )(Ablk, Xb, normsb, w1, b1, w2, b2, wf1, bf1, wf2, bf2, wf3p, bf3p)

    # torch.cat over graphs + .squeeze()
    return jnp.squeeze(out[:B, :outclass])


# -------------------------- Pure-JAX reference ------------------------------ #
def reference_forward(A, X, params):
    w1, b1, w2, b2, wf1, bf1, wf2, bf2, wf3, bf3 = params
    deg_in = jnp.sum(A, axis=-1, keepdims=True)
    deg_out = jnp.sum(A, axis=-2, keepdims=True)
    an = jax.lax.rsqrt(jnp.maximum(deg_in, 1.0)) * A * jax.lax.rsqrt(jnp.maximum(deg_out, 1.0))
    h = jnp.maximum(jnp.einsum("bnm,bmf->bnf", an, X @ w1) + b1, 0.0)
    h = jnp.maximum(jnp.einsum("bnm,bmf->bnf", an, h @ w2) + b2, 0.0)
    hg = jnp.sum(h, axis=1)
    z = jnp.maximum(hg @ wf1 + bf1, 0.0)
    z = jnp.maximum(z @ wf2 + bf2, 0.0)
    z = z @ wf3 + bf3
    return jnp.squeeze(z)


# ------------------------------ Param init --------------------------------- #
def xavier_uniform(key, fan_in, fan_out):
    bound = math.sqrt(6.0 / (fan_in + fan_out))
    return jax.random.uniform(key, (fan_in, fan_out), jnp.float32, -bound, bound)


def make_params(key, infeats, h1, h2, fc1, fc2, outclass):
    ks = jax.random.split(key, 12)
    # GraphConv weights (in, out); Linear weights stored transposed as (in, out)
    w1 = xavier_uniform(ks[0], infeats, h1)
    b1 = jnp.zeros((1, h1), jnp.float32)
    w2 = xavier_uniform(ks[1], h1, h2)
    b2 = jnp.zeros((1, h2), jnp.float32)
    wf1 = xavier_uniform(ks[2], h2, fc1)
    bf1 = jax.random.uniform(ks[3], (1, fc1), jnp.float32, -1.0, 1.0) / math.sqrt(h2)
    wf2 = xavier_uniform(ks[4], fc1, fc2)
    bf2 = jax.random.uniform(ks[5], (1, fc2), jnp.float32, -1.0, 1.0) / math.sqrt(fc1)
    wf3 = xavier_uniform(ks[6], fc2, outclass)
    bf3 = jax.random.uniform(ks[7], (1, outclass), jnp.float32, -1.0, 1.0) / math.sqrt(fc2)
    return (w1, b1, w2, b2, wf1, bf1, wf2, bf2, wf3, bf3)


# --------------------------------- Main ------------------------------------ #
if __name__ == "__main__":
    B, N = 2, 16                 # 2 graphs, 16 nodes each
    infeats, h1, h2 = 8, 16, 32
    fc1, fc2, outclass = 32, 16, 4

    key = jax.random.PRNGKey(0)
    k_adj, k_x, k_p = jax.random.split(key, 3)

    # Random undirected adjacency + self loops (dgl.add_self_loop)
    raw = (jax.random.uniform(k_adj, (B, N, N)) > 0.7).astype(jnp.float32)
    sym = jnp.maximum(raw, jnp.swapaxes(raw, -1, -2))
    A = jnp.maximum(sym, jnp.eye(N, dtype=jnp.float32)[None])

    X = jax.random.normal(k_x, (B, N, infeats), jnp.float32)
    params = make_params(k_p, infeats, h1, h2, fc1, fc2, outclass)

    out = model_nn2layer_forward(A, X, params)
    out = jax.block_until_ready(out)

    ref = reference_forward(A, X, params)
    assert out.shape == (B, outclass)
    assert jnp.allclose(out, ref, rtol=1e-3, atol=1e-3), "mismatch vs JAX reference"

    print("KERNEL_OK")
</pallas_src>

<mosaic_0001>
module attributes {stable_mosaic.version = 11 : i64} {
  func.func @_gnn2layer_kernel(%arg0: i32, %arg1: memref<1x128x128xbf16, #tpu.memory_space<vmem>>, %arg2: memref<1x128x8xf32, #tpu.memory_space<vmem>>, %arg3: memref<1x128x2xf32, #tpu.memory_space<vmem>>, %arg4: memref<8x16xf32, #tpu.memory_space<vmem>>, %arg5: memref<1x16xf32, #tpu.memory_space<vmem>>, %arg6: memref<16x32xf32, #tpu.memory_space<vmem>>, %arg7: memref<1x32xf32, #tpu.memory_space<vmem>>, %arg8: memref<32x32xf32, #tpu.memory_space<vmem>>, %arg9: memref<1x32xf32, #tpu.memory_space<vmem>>, %arg10: memref<32x16xf32, #tpu.memory_space<vmem>>, %arg11: memref<1x16xf32, #tpu.memory_space<vmem>>, %arg12: memref<16x128xf32, #tpu.memory_space<vmem>>, %arg13: memref<1x128xf32, #tpu.memory_space<vmem>>, %arg14: memref<8x128xf32, #tpu.memory_space<vmem>>) attributes {dimension_semantics = [#tpu.dimension_semantics<parallel>], iteration_bounds = array<i64: 1>, scalar_prefetch = 0 : i64, scratch_operands = 0 : i64, tpu.core_type = #tpu.core_type<tc>, window_params = [{transform_indices = @transform_0, window_bounds = array<i64: 1, 128, 128>}, {transform_indices = @transform_1, window_bounds = array<i64: 1, 128, 8>}, {transform_indices = @transform_2, window_bounds = array<i64: 1, 128, 2>}, {pipeline_mode = #tpu.pipeline_mode<synchronous>, transform_indices = @transform_3, window_bounds = array<i64: 8, 16>}, {pipeline_mode = #tpu.pipeline_mode<synchronous>, transform_indices = @transform_4, window_bounds = array<i64: 1, 16>}, {pipeline_mode = #tpu.pipeline_mode<synchronous>, transform_indices = @transform_5, window_bounds = array<i64: 16, 32>}, {pipeline_mode = #tpu.pipeline_mode<synchronous>, transform_indices = @transform_6, window_bounds = array<i64: 1, 32>}, {pipeline_mode = #tpu.pipeline_mode<synchronous>, transform_indices = @transform_7, window_bounds = array<i64: 32, 32>}, {pipeline_mode = #tpu.pipeline_mode<synchronous>, transform_indices = @transform_8, window_bounds = array<i64: 1, 32>}, {pipeline_mode = #tpu.pipeline_mode<synchronous>, transform_indices = @transform_9, window_bounds = array<i64: 32, 16>}, {pipeline_mode = #tpu.pipeline_mode<synchronous>, transform_indices = @transform_10, window_bounds = array<i64: 1, 16>}, {pipeline_mode = #tpu.pipeline_mode<synchronous>, transform_indices = @transform_11, window_bounds = array<i64: 16, 128>}, {pipeline_mode = #tpu.pipeline_mode<synchronous>, transform_indices = @transform_12, window_bounds = array<i64: 1, 128>}, {transform_indices = @transform_13, window_bounds = array<i64: 8, 128>}]} {
    %c0 = arith.constant 0 : index
    %c0_0 = arith.constant 0 : index
    %c0_1 = arith.constant 0 : index
    %0 = vector.load %arg1[%c0, %c0_0, %c0_1] : memref<1x128x128xbf16, #tpu.memory_space<vmem>>, vector<1x128x128xbf16>
    %1 = arith.extf %0 : vector<1x128x128xbf16> to vector<1x128x128xf32>
    %c0_2 = arith.constant 0 : index
    %c0_3 = arith.constant 0 : index
    %c0_4 = arith.constant 0 : index
    %2 = vector.load %arg2[%c0_2, %c0_3, %c0_4] : memref<1x128x8xf32, #tpu.memory_space<vmem>>, vector<1x128x8xf32>
    %c0_5 = arith.constant 0 : index
    %c0_6 = arith.constant 0 : index
    %c0_7 = arith.constant 0 : index
    %3 = vector.load %arg3[%c0_5, %c0_6, %c0_7] : memref<1x128x2xf32, #tpu.memory_space<vmem>>, vector<1x128x2xf32>
    %4 = vector.extract_strided_slice %3 {offsets = [0, 0, 0], sizes = [1, 128, 1], strides = [1, 1, 1]} : vector<1x128x2xf32> to vector<1x128x1xf32>
    %5 = vector.extract_strided_slice %3 {offsets = [0, 0, 1], sizes = [1, 128, 1], strides = [1, 1, 1]} : vector<1x128x2xf32> to vector<1x128x1xf32>
    %6 = vector.broadcast %4 : vector<1x128x1xf32> to vector<1x128x8xf32>
    %7 = arith.mulf %2, %6 : vector<1x128x8xf32>
    "tpu.trace_start"() <{level = 10 : i32, message = "gij,gjf->gif"}> : () -> ()
    %cst = arith.constant dense<0.000000e+00> : vector<1x128x8xf32>
    %8 = tpu.matmul %1, %7, %cst {dimension_numbers = #tpu.dot_dimension_numbers<[2], [1], [1], [2], [0, 0, 0, 1, 1, 2], [0], [0]>} : vector<1x128x128xf32>, vector<1x128x8xf32>, vector<1x128x8xf32> -> vector<1x128x8xf32>
    "tpu.trace_stop"() : () -> ()
    %9 = vector.broadcast %5 : vector<1x128x1xf32> to vector<1x128x8xf32>
    %10 = arith.mulf %8, %9 : vector<1x128x8xf32>
    %11 = vector.shape_cast %10 : vector<1x128x8xf32> to vector<128x8xf32>
    %c0_8 = arith.constant 0 : index
    %c0_9 = arith.constant 0 : index
    %12 = vector.load %arg4[%c0_8, %c0_9] : memref<8x16xf32, #tpu.memory_space<vmem>>, vector<8x16xf32>
    %cst_10 = arith.constant dense<0.000000e+00> : vector<128x16xf32>
    %13 = tpu.matmul %11, %12, %cst_10 {dimension_numbers = #tpu.dot_dimension_numbers<[1], [0], [0], [1], [0, 0, 1, 1], [], []>} : vector<128x8xf32>, vector<8x16xf32>, vector<128x16xf32> -> vector<128x16xf32>
    %c0_11 = arith.constant 0 : index
    %c0_12 = arith.constant 0 : index
    %14 = vector.load %arg5[%c0_11, %c0_12] : memref<1x16xf32, #tpu.memory_space<vmem>>, vector<1x16xf32>
    %15 = vector.broadcast %14 : vector<1x16xf32> to vector<128x16xf32>
    %16 = arith.addf %13, %15 : vector<128x16xf32>
    %cst_13 = arith.constant 0.000000e+00 : f32
    %17 = vector.broadcast %cst_13 : f32 to vector<128x16xf32>
    %18 = arith.maximumf %16, %17 : vector<128x16xf32>
    %19 = vector.shape_cast %18 : vector<128x16xf32> to vector<1x128x16xf32>
    %20 = vector.broadcast %4 : vector<1x128x1xf32> to vector<1x128x16xf32>
    %21 = arith.mulf %19, %20 : vector<1x128x16xf32>
    "tpu.trace_start"() <{level = 10 : i32, message = "gij,gjf->gif"}> : () -> ()
    %cst_14 = arith.constant dense<0.000000e+00> : vector<1x128x16xf32>
    %22 = tpu.matmul %1, %21, %cst_14 {dimension_numbers = #tpu.dot_dimension_numbers<[2], [1], [1], [2], [0, 0, 0, 1, 1, 2], [0], [0]>} : vector<1x128x128xf32>, vector<1x128x16xf32>, vector<1x128x16xf32> -> vector<1x128x16xf32>
    "tpu.trace_stop"() : () -> ()
    %23 = vector.broadcast %5 : vector<1x128x1xf32> to vector<1x128x16xf32>
    %24 = arith.mulf %22, %23 : vector<1x128x16xf32>
    %25 = vector.shape_cast %24 : vector<1x128x16xf32> to vector<128x16xf32>
    %c0_15 = arith.constant 0 : index
    %c0_16 = arith.constant 0 : index
    %26 = vector.load %arg6[%c0_15, %c0_16] : memref<16x32xf32, #tpu.memory_space<vmem>>, vector<16x32xf32>
    %cst_17 = arith.constant dense<0.000000e+00> : vector<128x32xf32>
    %27 = tpu.matmul %25, %26, %cst_17 {dimension_numbers = #tpu.dot_dimension_numbers<[1], [0], [0], [1], [0, 0, 1, 1], [], []>} : vector<128x16xf32>, vector<16x32xf32>, vector<128x32xf32> -> vector<128x32xf32>
    %c0_18 = arith.constant 0 : index
    %c0_19 = arith.constant 0 : index
    %28 = vector.load %arg7[%c0_18, %c0_19] : memref<1x32xf32, #tpu.memory_space<vmem>>, vector<1x32xf32>
    %29 = vector.broadcast %28 : vector<1x32xf32> to vector<128x32xf32>
    %30 = arith.addf %27, %29 : vector<128x32xf32>
    %cst_20 = arith.constant 0.000000e+00 : f32
    %31 = vector.broadcast %cst_20 : f32 to vector<128x32xf32>
    %32 = arith.maximumf %30, %31 : vector<128x32xf32>
    %33 = vector.shape_cast %32 : vector<128x32xf32> to vector<8x16x32xf32>
    %cst_21 = arith.constant dense<0.000000e+00> : vector<8x32xf32>
    %34 = vector.multi_reduction <add>, %33, %cst_21 [1] : vector<8x16x32xf32> to vector<8x32xf32>
    %c0_22 = arith.constant 0 : index
    %c0_23 = arith.constant 0 : index
    %35 = vector.load %arg8[%c0_22, %c0_23] : memref<32x32xf32, #tpu.memory_space<vmem>>, vector<32x32xf32>
    %cst_24 = arith.constant dense<0.000000e+00> : vector<8x32xf32>
    %36 = tpu.matmul %34, %35, %cst_24 {dimension_numbers = #tpu.dot_dimension_numbers<[1], [0], [0], [1], [0, 0, 1, 1], [], []>} : vector<8x32xf32>, vector<32x32xf32>, vector<8x32xf32> -> vector<8x32xf32>
    %c0_25 = arith.constant 0 : index
    %c0_26 = arith.constant 0 : index
    %37 = vector.load %arg9[%c0_25, %c0_26] : memref<1x32xf32, #tpu.memory_space<vmem>>, vector<1x32xf32>
    %38 = vector.broadcast %37 : vector<1x32xf32> to vector<8x32xf32>
    %39 = arith.addf %36, %38 : vector<8x32xf32>
    %cst_27 = arith.constant 0.000000e+00 : f32
    %40 = vector.broadcast %cst_27 : f32 to vector<8x32xf32>
    %41 = arith.maximumf %39, %40 : vector<8x32xf32>
    %c0_28 = arith.constant 0 : index
    %c0_29 = arith.constant 0 : index
    %42 = vector.load %arg10[%c0_28, %c0_29] : memref<32x16xf32, #tpu.memory_space<vmem>>, vector<32x16xf32>
    %cst_30 = arith.constant dense<0.000000e+00> : vector<8x16xf32>
    %43 = tpu.matmul %41, %42, %cst_30 {dimension_numbers = #tpu.dot_dimension_numbers<[1], [0], [0], [1], [0, 0, 1, 1], [], []>} : vector<8x32xf32>, vector<32x16xf32>, vector<8x16xf32> -> vector<8x16xf32>
    %c0_31 = arith.constant 0 : index
    %c0_32 = arith.constant 0 : index
    %44 = vector.load %arg11[%c0_31, %c0_32] : memref<1x16xf32, #tpu.memory_space<vmem>>, vector<1x16xf32>
    %45 = vector.broadcast %44 : vector<1x16xf32> to vector<8x16xf32>
    %46 = arith.addf %43, %45 : vector<8x16xf32>
    %cst_33 = arith.constant 0.000000e+00 : f32
    %47 = vector.broadcast %cst_33 : f32 to vector<8x16xf32>
    %48 = arith.maximumf %46, %47 : vector<8x16xf32>
    %c0_34 = arith.constant 0 : index
    %c0_35 = arith.constant 0 : index
    %49 = vector.load %arg12[%c0_34, %c0_35] : memref<16x128xf32, #tpu.memory_space<vmem>>, vector<16x128xf32>
    %cst_36 = arith.constant dense<0.000000e+00> : vector<8x128xf32>
    %50 = tpu.matmul %48, %49, %cst_36 {dimension_numbers = #tpu.dot_dimension_numbers<[1], [0], [0], [1], [0, 0, 1, 1], [], []>} : vector<8x16xf32>, vector<16x128xf32>, vector<8x128xf32> -> vector<8x128xf32>
    %c0_37 = arith.constant 0 : index
    %c0_38 = arith.constant 0 : index
    %51 = vector.load %arg13[%c0_37, %c0_38] : memref<1x128xf32, #tpu.memory_space<vmem>>, vector<1x128xf32>
    %52 = vector.broadcast %51 : vector<1x128xf32> to vector<8x128xf32>
    %53 = arith.addf %50, %52 : vector<8x128xf32>
    %c0_39 = arith.constant 0 : index
    %c0_40 = arith.constant 0 : index
    %54 = vector.load %arg14[%c0_39, %c0_40] : memref<8x128xf32, #tpu.memory_space<vmem>>, vector<8x128xf32>
    tpu.vector_store %arg14[%c0_39, %c0_40], %53 {strides = array<i32>} : memref<8x128xf32, #tpu.memory_space<vmem>>, vector<8x128xf32>,
    return
  }
  func.func @transform_0(%arg0: i32) -> (i32, i32, i32) {
    %c0_i32 = arith.constant 0 : i32
    %c0_i32_0 = arith.constant 0 : i32
    %c0_i32_1 = arith.constant 0 : i32
    return %arg0, %c0_i32, %c0_i32_0 : i32, i32, i32
  }
  func.func @transform_1(%arg0: i32) -> (i32, i32, i32) {
    %c0_i32 = arith.constant 0 : i32
    %c0_i32_0 = arith.constant 0 : i32
    %c0_i32_1 = arith.constant 0 : i32
    return %arg0, %c0_i32, %c0_i32_0 : i32, i32, i32
  }
  func.func @transform_2(%arg0: i32) -> (i32, i32, i32) {
    %c0_i32 = arith.constant 0 : i32
    %c0_i32_0 = arith.constant 0 : i32
    %c0_i32_1 = arith.constant 0 : i32
    return %arg0, %c0_i32, %c0_i32_0 : i32, i32, i32
  }
  func.func @transform_3(%arg0: i32) -> (i32, i32) {
    %c0_i32 = arith.constant 0 : i32
    %c0_i32_0 = arith.constant 0 : i32
    %c0_i32_1 = arith.constant 0 : i32
    return %c0_i32, %c0_i32_0 : i32, i32
  }
  func.func @transform_4(%arg0: i32) -> (i32, i32) {
    %c0_i32 = arith.constant 0 : i32
    %c0_i32_0 = arith.constant 0 : i32
    %c0_i32_1 = arith.constant 0 : i32
    return %c0_i32, %c0_i32_0 : i32, i32
  }
  func.func @transform_5(%arg0: i32) -> (i32, i32) {
    %c0_i32 = arith.constant 0 : i32
    %c0_i32_0 = arith.constant 0 : i32
    %c0_i32_1 = arith.constant 0 : i32
    return %c0_i32, %c0_i32_0 : i32, i32
  }
  func.func @transform_6(%arg0: i32) -> (i32, i32) {
    %c0_i32 = arith.constant 0 : i32
    %c0_i32_0 = arith.constant 0 : i32
    %c0_i32_1 = arith.constant 0 : i32
    return %c0_i32, %c0_i32_0 : i32, i32
  }
  func.func @transform_7(%arg0: i32) -> (i32, i32) {
    %c0_i32 = arith.constant 0 : i32
    %c0_i32_0 = arith.constant 0 : i32
    %c0_i32_1 = arith.constant 0 : i32
    return %c0_i32, %c0_i32_0 : i32, i32
  }
  func.func @transform_8(%arg0: i32) -> (i32, i32) {
    %c0_i32 = arith.constant 0 : i32
    %c0_i32_0 = arith.constant 0 : i32
    %c0_i32_1 = arith.constant 0 : i32
    return %c0_i32, %c0_i32_0 : i32, i32
  }
  func.func @transform_9(%arg0: i32) -> (i32, i32) {
    %c0_i32 = arith.constant 0 : i32
    %c0_i32_0 = arith.constant 0 : i32
    %c0_i32_1 = arith.constant 0 : i32
    return %c0_i32, %c0_i32_0 : i32, i32
  }
  func.func @transform_10(%arg0: i32) -> (i32, i32) {
    %c0_i32 = arith.constant 0 : i32
    %c0_i32_0 = arith.constant 0 : i32
    %c0_i32_1 = arith.constant 0 : i32
    return %c0_i32, %c0_i32_0 : i32, i32
  }
  func.func @transform_11(%arg0: i32) -> (i32, i32) {
    %c0_i32 = arith.constant 0 : i32
    %c0_i32_0 = arith.constant 0 : i32
    %c0_i32_1 = arith.constant 0 : i32
    return %c0_i32, %c0_i32_0 : i32, i32
  }
  func.func @transform_12(%arg0: i32) -> (i32, i32) {
    %c0_i32 = arith.constant 0 : i32
    %c0_i32_0 = arith.constant 0 : i32
    %c0_i32_1 = arith.constant 0 : i32
    return %c0_i32, %c0_i32_0 : i32, i32
  }
  func.func @transform_13(%arg0: i32) -> (i32, i32) {
    %c0_i32 = arith.constant 0 : i32
    %c0_i32_0 = arith.constant 0 : i32
    return %arg0, %c0_i32 : i32, i32
  }
}

</mosaic_0001>

<bundles_post_ra>
// kernel: tpu_custom_call.1
= control target key start
LH: loop header
LB: loop body
LE: loop exit
PB: predicated region body
PF: predicated region fallthrough
CT: control target
= control target key end

     0   :  { %v1908_v2 = vmov 0   ;;  %s2495_s0 = inlined_call_operand.vmem [shape: bf16[1,128,128], index: 0, kind: input, shape index: {}]   ;;  %s2496_s1 = inlined_call_operand.vmem [shape: f32[1,128,8], index: 1, kind: input, shape index: {}]   ;;  %s2497_s2 = inlined_call_operand.vmem [shape: f32[1,128,2], index: 2, kind: input, shape index: {}]   ;;  %s2498_s3 = inlined_call_operand.vmem [shape: f32[8,16], index: 3, kind: input, shape index: {}]   ;;  %s2499_s4 = inlined_call_operand.vmem [shape: f32[1,16], index: 4, kind: input, shape index: {}]   ;;  %s2500_s5 = inlined_call_operand.vmem [shape: f32[16,32], index: 5, kind: input, shape index: {}]   ;;  %s2501_s6 = inlined_call_operand.vmem [shape: f32[1,32], index: 6, kind: input, shape index: {}]   ;;  %s2502_s7 = inlined_call_operand.vmem [shape: f32[32,32], index: 7, kind: input, shape index: {}]   ;;  %s2503_s8 = inlined_call_operand.vmem [shape: f32[1,32], index: 8, kind: input, shape index: {}]   ;;  %s2504_s9 = inlined_call_operand.vmem [shape: f32[32,16], index: 9, kind: input, shape index: {}]   ;;  %s2505_s10 = inlined_call_operand.vmem [shape: f32[1,16], index: 10, kind: input, shape index: {}]   ;;  %s2506_s11 = inlined_call_operand.vmem [shape: f32[16,128], index: 11, kind: input, shape index: {}]   ;;  %s2507_s12 = inlined_call_operand.vmem [shape: f32[1,128], index: 12, kind: input, shape index: {}]   ;;  %s2508_s13 = inlined_call_operand.hbm [shape: f32[8,128], index: 13, kind: output, shape index: {}]  }
   0x1   :  { %v95_v0 = vld [vmem:[%s2497_s2 + $0x10] sm:$0xff]  ;;  %v93_v1 = vld [vmem:[%s2497_s2] sm:$0xff]  ;;  %1881 = vset.pattern.permute.xlu1 %v1908_v2  ;;  %1880 = vset.pattern.permute.xlu0 %v1908_v2  ;;  %v96_v3 = vld [vmem:[%s2497_s2 + $0x18] sm:$0xff] }
   0x2   :  { %121 = vperm.xlu1 %1881, %v95_v0   ;;  %111 = vperm.xlu0 %1880, %v93_v1   ;;  %v94_v4 = vld [vmem:[%s2497_s2 + $0x8] sm:$0xff] }
   0x6   :  { %126 = vperm.xlu1 %1881, %v96_v3   ;;  %116 = vperm.xlu0 %1880, %v94_v4  }
   0x7   :  { %18 = vsyncpa [#allocation3], 0  ;;  %v98_v5 = vld [vmem:[%s2497_s2 + $0x28] sm:$0xff]  ;;  %v97_v6 = vld [vmem:[%s2497_s2 + $0x20] sm:$0xff]  ;;  %v1909_v19 = vmov 1   ;;  %vm438_vm0 = vcmask 64512  }
   0x8   :  { %v100_v7 = vld [vmem:[%s2497_s2 + $0x38] sm:$0xff]  ;;  %v99_v8 = vld [vmem:[%s2497_s2 + $0x30] sm:$0xff]  ;;  %v102_v9 = vld [vmem:[%s2497_s2 + $0x48] sm:$0xff]  ;;  %vm834_vm1 = vcmask 130048   ;;  %vm1911_vm2 = vmmov 0   ;;  %vm1044_vm3 = vcmask 261120  }
   0x9   :  { %v101_v10 = vld [vmem:[%s2497_s2 + $0x40] sm:$0xff]  ;;  %v104_v11 = vld [vmem:[%s2497_s2 + $0x58] sm:$0xff]  ;;  %v103_v12 = vld [vmem:[%s2497_s2 + $0x50] sm:$0xff]  ;;  %vm1136_vm4 = vcmask 1041409   ;;  %vm1138_vm5 = vcmask 1042434   ;;  %vm1140_vm6 = vcmask 1043459  }
   0xa   :  { %136 = vperm.xlu1 %1881, %v98_v5   ;;  %131 = vperm.xlu0 %1880, %v97_v6   ;;  %v106_v13 = vld [vmem:[%s2497_s2 + $0x68] sm:$0xff]  ;;  %v105_v14 = vld [vmem:[%s2497_s2 + $0x60] sm:$0xff]  ;;  %v108_v15 = vld [vmem:[%s2497_s2 + $0x78] sm:$0xff]  ;;  %vm1142_vm7 = vcmask 1044484   ;;  %vm1144_vm8 = vcmask 1045509   ;;  %vm1146_vm9 = vcmask 1046534  }
   0xb   :  { %v107_v16 = vld [vmem:[%s2497_s2 + $0x70] sm:$0xff]  ;;  %v2035_v17 = vld [vmem:[%s2495_s0] sm:$0xff]   ;;  %v80_v24 = vld [vmem:[%s2496_s1 + $0x18] sm:$0xff]  ;;  %vm1148_vm10 = vcmask 1047559  }
   0xc   :  { %v1447_v18 = vunpack.c.l.bf16 %v2035_v17  ;;  %v79_v22 = vld [vmem:[%s2496_s1 + $0x10] sm:$0xff]  ;;  %v77_v23 = vld [vmem:[%s2496_s1] sm:$0xff]  ;;  %v78_v25 = vld [vmem:[%s2496_s1 + $0x8] sm:$0xff] }
   0xd   :  { %v82_v32 = vld [vmem:[%s2496_s1 + $0x28] sm:$0xff]  ;;  %v81_v33 = vld [vmem:[%s2496_s1 + $0x20] sm:$0xff]  ;;  %v84_v40 = vld [vmem:[%s2496_s1 + $0x38] sm:$0xff] }
   0xe   :  { %146 = vperm.xlu1 %1881, %v100_v7   ;;  %141 = vperm.xlu0 %1880, %v99_v8   ;;  %v83_v41 = vld [vmem:[%s2496_s1 + $0x30] sm:$0xff]  ;;  %v86_v47 = vld [vmem:[%s2496_s1 + $0x48] sm:$0xff]  ;;  %v85_v48 = vld [vmem:[%s2496_s1 + $0x40] sm:$0xff] }
   0xf   :  { %1628 = vmatprep.mubr.f32.mxu0 %v1447_v18  ;;  %v88_v54 = vld [vmem:[%s2496_s1 + $0x58] sm:$0xff]  ;;  %v87_v55 = vld [vmem:[%s2496_s1 + $0x50] sm:$0xff]  ;;  %v90_v61 = vld [vmem:[%s2496_s1 + $0x68] sm:$0xff] }
  0x10   :  { %v89_v62 = vld [vmem:[%s2496_s1 + $0x60] sm:$0xff] }
  0x12   :  { %156 = vperm.xlu1 %1881, %v102_v9   ;;  %151 = vperm.xlu0 %1880, %v101_v10  }
  0x16   :  { %166 = vperm.xlu1 %1881, %v104_v11   ;;  %161 = vperm.xlu0 %1880, %v103_v12  }
  0x1a   :  { %176 = vperm.xlu1 %1881, %v106_v13   ;;  %171 = vperm.xlu0 %1880, %v105_v14  }
  0x1e   :  { %186 = vperm.xlu1 %1881, %v108_v15   ;;  %181 = vperm.xlu0 %1880, %v107_v16  }
  0x22   :  { %1883 = vset.pattern.permute.xlu1 %v1909_v19  ;;  %1882 = vset.pattern.permute.xlu0 %v1909_v19 }
  0x23   :  { %355 = vperm.xlu1 %1883, %v94_v4   ;;  %351 = vperm.xlu0 %1882, %v93_v1   ;;  %v92_v4 = vld [vmem:[%s2496_s1 + $0x78] sm:$0xff] }
  0x27   :  { %359 = vperm.xlu1 %1883, %v95_v0   ;;  %363 = vperm.xlu0 %1882, %v96_v3  }
  0x2b   :  { %367 = vperm.xlu1 %1883, %v97_v6   ;;  %371 = vperm.xlu0 %1882, %v98_v5   ;;  %v91_v5 = vld [vmem:[%s2496_s1 + $0x70] sm:$0xff] }
  0x2f   :  { %375 = vperm.xlu1 %1883, %v99_v8   ;;  %379 = vperm.xlu0 %1882, %v100_v7  }
  0x33   :  { %383 = vperm.xlu1 %1883, %v101_v10   ;;  %387 = vperm.xlu0 %1882, %v102_v9  }
  0x37   :  { %391 = vperm.xlu1 %1883, %v103_v12   ;;  %395 = vperm.xlu0 %1882, %v104_v11   ;;  %v2139_v12 = vld [vmem:[%s2495_s0 + $0x8] sm:$0xff]  }
  0x3b   :  { %399 = vperm.xlu1 %1883, %v105_v14   ;;  %403 = vperm.xlu0 %1882, %v106_v13   ;;  %v1448_v13 = vunpack.c.h.bf16 %v2035_v17  ;;  %v1451_v14 = vunpack.c.l.bf16 %v2139_v12 }
  0x3f   :  { %407 = vperm.xlu1 %1883, %v107_v16   ;;  %411 = vperm.xlu0 %1882, %v108_v15   ;;  %v2146_v15 = vld [vmem:[%s2495_s0 + $0x10] sm:$0xff]   ;;  %v1452_v16 = vunpack.c.h.bf16 %v2139_v12 }
  0x40   :  { %v1455_v19 = vunpack.c.l.bf16 %v2146_v15 }
  0x81   :  { %v2040_v20 = vpop.permute.xlu1 %121  ;;  %v2042_v21 = vpop.permute.xlu0 %111 }
  0x82   :  { %v191_v28 = vmul.f32 %v2040_v20, %v79_v22  ;;  %v189_v29 = vmul.f32 %v2042_v21, %v77_v23  ;;  %v2157_v22 = vld [vmem:[%s2495_s0 + $0x18] sm:$0xff]   ;;  %v1456_v23 = vunpack.c.h.bf16 %v2146_v15 }
  0x85   :  { %v2056_v26 = vpop.permute.xlu1 %126  ;;  %v2058_v27 = vpop.permute.xlu0 %116 }
  0x86   :  { %v192_v30 = vmul.f32 %v2056_v26, %v80_v24  ;;  %v190_v31 = vmul.f32 %v2058_v27, %v78_v25  ;;  %v1459_v24 = vunpack.c.l.bf16 %v2157_v22  ;;  %v2168_v25 = vld [vmem:[%s2495_s0 + $0x20] sm:$0xff]  }
  0x87   :  { %v2517_v17 = vunpack.c.l.bf16 %v2168_v25 }
  0x88   :  { %v1791_v34 = vpack.c.bf16 %v190_v31, %v189_v29  ;;  %v1795_v37 = vpack.c.bf16 %v192_v30, %v191_v28  ;;  %v1460_v28 = vunpack.c.h.bf16 %v2157_v22  ;;  %v2516_v29 = vunpack.c.l.bf16 %v2168_v25  ;;  %v2179_v30 = vld [vmem:[%s2495_s0 + $0x28] sm:$0xff]  }
  0x89   :  { %v2070_v35 = vpop.permute.xlu1 %136  ;;  %v2072_v36 = vpop.permute.xlu0 %131  ;;  %v2515_v31 = vunpack.c.h.bf16 %v2168_v25 }
  0x8a   :  { %v194_v38 = vmul.f32 %v2070_v35, %v82_v32  ;;  %v193_v39 = vmul.f32 %v2072_v36, %v81_v33  ;;  %1792 = vmatprep.subr.bf16.mxu0 %v1791_v34  ;;  %v2514_v32 = vunpack.c.l.bf16 %v2179_v30  ;;  %v2190_v33 = vld [vmem:[%s2495_s0 + $0x30] sm:$0xff]  }
  0x8b   :  { %1794 = vmatpush3.bf16.msra.mxu0 %v1791_v34  ;;  %v2513_v34 = vunpack.c.h.bf16 %v2179_v30  ;;  %v2522_v12 = vunpack.c.h.bf16 %v2190_v33 }
  0x8c   :  { %1796 = vmatprep.subr.bf16.mxu0 %v1795_v37  ;;  %v1799_v44 = vpack.c.bf16 %v194_v38, %v193_v39  ;;  %v2201_v38 = vld [vmem:[%s2495_s0 + $0x38] sm:$0xff]   ;;  %v2511_v39 = vunpack.c.h.bf16 %v2190_v33 }
  0x8d   :  { %v2082_v42 = vpop.permute.xlu1 %146  ;;  %v2084_v43 = vpop.permute.xlu0 %141 }
  0x8e   :  { %v196_v45 = vmul.f32 %v2082_v42, %v84_v40  ;;  %v195_v46 = vmul.f32 %v2084_v43, %v83_v41  ;;  %v2510_v40 = vunpack.c.l.bf16 %v2201_v38  ;;  %v2509_v41 = vunpack.c.h.bf16 %v2201_v38 }
  0x8f   :  { %1798 = vmatpush3.bf16.msra.mxu0 %v1795_v37  ;;  %v2512_v37 = vunpack.c.l.bf16 %v2190_v33 }
  0x90   :  { %1800 = vmatprep.subr.bf16.mxu0 %v1799_v44  ;;  %v1803_v51 = vpack.c.bf16 %v196_v45, %v195_v46 }
  0x91   :  { %v2094_v49 = vpop.permute.xlu1 %156  ;;  %v2096_v50 = vpop.permute.xlu0 %151 }
  0x92   :  { %v198_v52 = vmul.f32 %v2094_v49, %v86_v47  ;;  %v197_v53 = vmul.f32 %v2096_v50, %v85_v48 }
  0x93   :  { %1802 = vmatpush3.bf16.msra.mxu0 %v1799_v44  ;;  %v430_v44 = vld [vmem:[%s2498_s3] sm:$0xff] }
  0x94   :  { %1804 = vmatprep.subr.bf16.mxu0 %v1803_v51  ;;  %v1807_v58 = vpack.c.bf16 %v198_v52, %v197_v53  ;;  %1652 = vmatprep.subr.mxu1 %v430_v44 }
  0x95   :  { %v2106_v56 = vpop.permute.xlu1 %166  ;;  %v2108_v57 = vpop.permute.xlu0 %161  ;;  %1653 = vmatpush3.msra.mxu1 %v430_v44 }
  0x96   :  { %v200_v59 = vmul.f32 %v2106_v56, %v88_v54  ;;  %v199_v60 = vmul.f32 %v2108_v57, %v87_v55 }
  0x97   :  { %1806 = vmatpush3.bf16.msra.mxu0 %v1803_v51 }
  0x98   :  { %1808 = vmatprep.subr.bf16.mxu0 %v1807_v58  ;;  %v1811_v1 = vpack.c.bf16 %v200_v59, %v199_v60 }
  0x99   :  { %v2118_v63 = vpop.permute.xlu1 %176  ;;  %v2120_v0 = vpop.permute.xlu0 %171 }
  0x9a   :  { %v202_v2 = vmul.f32 %v2118_v63, %v90_v61  ;;  %v201_v3 = vmul.f32 %v2120_v0, %v89_v62 }
  0x9b   :  { %1810 = vmatpush3.bf16.msra.mxu0 %v1807_v58 }
  0x9c   :  { %1812 = vmatprep.subr.bf16.mxu0 %v1811_v1  ;;  %v1815_v8 = vpack.c.bf16 %v202_v2, %v201_v3 }
  0x9d   :  { %v2130_v6 = vpop.permute.xlu1 %186  ;;  %v2132_v7 = vpop.permute.xlu0 %181 }
  0x9e   :  { %v204_v9 = vmul.f32 %v2130_v6, %v92_v4  ;;  %v203_v10 = vmul.f32 %v2132_v7, %v91_v5 }
  0x9f   :  { %1814 = vmatpush3.bf16.msra.mxu0 %v1811_v1 }
  0xa0   :  { %1816 = vmatprep.subr.bf16.mxu0 %v1815_v8  ;;  %v1819_v11 = vpack.c.bf16 %v204_v9, %v203_v10 }
  0xa2   :  { %v2219_v45 = vpop.permute.xlu1 %355  ;;  %v2221_v46 = vpop.permute.xlu0 %351 }
  0xa3   :  { %1818 = vmatpush3.bf16.msra.mxu0 %v1815_v8 }
  0xa4   :  { %1820 = vmatprep.subr.bf16.mxu0 %v1819_v11 }
  0xa6   :  { %v2223_v47 = vpop.permute.xlu1 %359  ;;  %v2225_v48 = vpop.permute.xlu0 %363 }
  0xa7   :  { %1822 = vmatpush3.bf16.msra.mxu0 %v1819_v11 }
  0xaa   :  { %1629 = vmatmul.mubr.f32.vlgmr.msra.gmra.mrb[0].mxu0 %v1448_v13  ;;  %v2227_v51 = vpop.permute.xlu1 %367  ;;  %v2229_v52 = vpop.permute.xlu0 %371 }
  0xab   :  { %1631 = vmatprep.mubr.f32.mxu0 %v1451_v14 }
  0xae   :  { %1632 = vmatmul.mubr.f32.gmra.mrb[2].mxu0 %v1452_v16  ;;  %v2234_v60 = vpop.permute.xlu1 %375  ;;  %v2237_v62 = vpop.permute.xlu0 %379 }
  0xaf   :  { %1634 = vmatprep.mubr.f32.mxu0 %v1455_v19 }
  0xb2   :  { %1635 = vmatmul.mubr.f32.gmra.mrb[4].mxu0 %v1456_v23  ;;  %v2244_v8 = vpop.permute.xlu1 %383  ;;  %v2247_v10 = vpop.permute.xlu0 %387 }
  0xb3   :  { %1637 = vmatprep.mubr.f32.mxu0 %v1459_v24 }
  0xb6   :  { %1638 = vmatmul.mubr.f32.gmra.mrb[6].mxu0 %v1460_v28 }
  0xb7   :  { %1640 = vmatprep.mubr.f32.mxu0 %v2516_v29 }
  0xba   :  { %1641 = vmatmul.mubr.f32.gmra.mrb[8].mxu0 %v2515_v31 }
  0xbb   :  { %1643 = vmatprep.mubr.f32.mxu0 %v2514_v32 }
  0xbe   :  { %1644 = vmatmul.mubr.f32.gmra.mrb[10].mxu0 %v2513_v34 }
  0xbf   :  { %1646 = vmatprep.mubr.f32.mxu0 %v2512_v37 }
  0xc2   :  { %1647 = vmatmul.mubr.f32.gmra.mrb[12].mxu0 %v2511_v39 }
  0xc3   :  { %1649 = vmatprep.mubr.f32.mxu0 %v2510_v40 }
  0xc6   :  { %1650 = vmatmul.mubr.f32.gmra.mrb[14].mxu0 %v2509_v41 }
 0x17d   :  { %v1630_v53 = vpop.f32.mrb[0].mxu0 }
 0x17e   :  { %v271_v54 = vpop.f32.mrb[1].mxu0  ;;  %v415_v58 = vmul.f32 %v1630_v53, %v2219_v45 }
 0x17f   :  { %v414_v55 = vmul.f32 %v2221_v46, %v271_v54 }
 0x181   :  { %v1633_v59 = vpop.f32.mrb[2].mxu0  ;;  %1654 = vmatprep.mubr.msk.f32.mxu1 %vm438_vm0, %v414_v55 }
 0x182   :  { %v281_v61 = vpop.f32.mrb[3].mxu0  ;;  %1655 = vmatmul.mubr.msk.f32.vlgmr.msra.gmra.mrb[0].mxu1 %vm438_vm0, %v415_v58  ;;  %v417_v2 = vmul.f32 %v1633_v59, %v2225_v48  ;;  %v2254_v58 = vpop.permute.xlu1 %391 }
 0x183   :  { %v416_v1 = vmul.f32 %v2223_v47, %v281_v61  ;;  %v2257_v61 = vpop.permute.xlu0 %395 }
 0x185   :  { %v1636_v3 = vpop.f32.mrb[4].mxu0  ;;  %1657 = vmatprep.mubr.msk.f32.mxu1 %vm438_vm0, %v416_v1 }
 0x186   :  { %v291_v4 = vpop.f32.mrb[5].mxu0  ;;  %1658 = vmatmul.mubr.msk.f32.gmra.mrb[2].mxu1 %vm438_vm0, %v417_v2  ;;  %v419_v9 = vmul.f32 %v1636_v3, %v2229_v52 }
 0x187   :  { %v418_v5 = vmul.f32 %v2227_v51, %v291_v4 }
 0x189   :  { %v1639_v11 = vpop.f32.mrb[6].mxu0  ;;  %1660 = vmatprep.mubr.msk.f32.mxu1 %vm438_vm0, %v418_v5 }
 0x18a   :  { %v301_v44 = vpop.f32.mrb[7].mxu0  ;;  %1661 = vmatmul.mubr.msk.f32.gmra.mrb[4].mxu1 %vm438_vm0, %v419_v9  ;;  %v421_v54 = vmul.f32 %v1639_v11, %v2237_v62  ;;  %v2264_v9 = vpop.permute.xlu1 %399 }
 0x18b   :  { %v420_v53 = vmul.f32 %v2234_v60, %v301_v44  ;;  %v2267_v44 = vpop.permute.xlu0 %403 }
 0x18d   :  { %v1642_v55 = vpop.f32.mrb[8].mxu0  ;;  %1663 = vmatprep.mubr.msk.f32.mxu1 %vm438_vm0, %v420_v53 }
 0x18e   :  { %v311_v59 = vpop.f32.mrb[9].mxu0  ;;  %1664 = vmatmul.mubr.msk.f32.gmra.mrb[6].mxu1 %vm438_vm0, %v421_v54  ;;  %v423_v2 = vmul.f32 %v1642_v55, %v2247_v10 }
 0x18f   :  { %v422_v1 = vmul.f32 %v2244_v8, %v311_v59 }
 0x191   :  { %v1645_v3 = vpop.f32.mrb[10].mxu0  ;;  %1666 = vmatprep.mubr.msk.f32.mxu1 %vm438_vm0, %v422_v1 }
 0x192   :  { %v321_v4 = vpop.f32.mrb[11].mxu0  ;;  %1667 = vmatmul.mubr.msk.f32.gmra.mrb[8].mxu1 %vm438_vm0, %v423_v2  ;;  %v425_v11 = vmul.f32 %v1645_v3, %v2257_v61  ;;  %v2274_v2 = vpop.permute.xlu1 %407 }
 0x193   :  { %v424_v5 = vmul.f32 %v2254_v58, %v321_v4  ;;  %v2277_v3 = vpop.permute.xlu0 %411 }
 0x195   :  { %v1648_v53 = vpop.f32.mrb[12].mxu0  ;;  %1669 = vmatprep.mubr.msk.f32.mxu1 %vm438_vm0, %v424_v5 }
 0x196   :  { %v331_v54 = vpop.f32.mrb[13].mxu0  ;;  %1670 = vmatmul.mubr.msk.f32.gmra.mrb[10].mxu1 %vm438_vm0, %v425_v11  ;;  %v427_v59 = vmul.f32 %v1648_v53, %v2267_v44  ;;  %v825_v11 = vld [vmem:[%s2500_s5] sm:$0xff]  ;;  %v826_v53 = vld [vmem:[%s2500_s5 + $0x8] sm:$0xff]  ;;  %s1913_s5 = smov [#allocation2]  }
 0x197   :  { %v426_v55 = vmul.f32 %v2264_v9, %v331_v54  ;;  %v1855_v54 = vpack.c.bf16 %v826_v53, %v825_v11  ;;  %s1397_s22 = sshll.u32 %s1913_s5, 4  ;;  %s1398_s22 = int_to_ptr.vmem [resolvable:$true] %s1397_s22 }
 0x198   :  { %p1889_p1 = scmp.lt.s32.totalorder %s1398_s22, %s1398_s22 }
 0x199   :  { %v1651_v1 = vpop.f32.mrb[14].mxu0  ;;  %1672 = vmatprep.mubr.msk.f32.mxu1 %vm438_vm0, %v426_v55  ;;  %1856 = vmatprep.subr.bf16.mxu0 %v1855_v54 }
 0x19a   :  { %v341_v4 = vpop.f32.mrb[15].mxu0  ;;  %1673 = vmatmul.mubr.msk.f32.gmra.mrb[12].mxu1 %vm438_vm0, %v427_v59  ;;  %v429_v5 = vmul.f32 %v1651_v1, %v2277_v3  ;;  %1858 = vmatpush3.bf16.msra.mxu0 %v1855_v54 }
 0x19b   :  { %v428_v41 = vmul.f32 %v2274_v2, %v341_v4 }
 0x19d   :  { %1675 = vmatprep.mubr.msk.f32.mxu1 %vm438_vm0, %v428_v41  ;;  %v2294_v41 = vld [vmem:[%s2499_s4] ss:$0 sm:$0xff] }
 0x19e   :  { %1676 = vmatmul.mubr.msk.f32.gmra.mrb[14].mxu1 %vm438_vm0, %v429_v5 }
 0x19f   :  { %1710 = vmatprep.mubr.f32.mxu1 %v1447_v18 }
 0x255   :  { %v1656_v55 = vpop.f32.mrb[0].mxu1 }
 0x256   :  { %v559_v59 = vadd.f32 %v1656_v55, %v2294_v41  ;;  %v553_v18 = vpop.f32.mrb[1].mxu1 }
 0x257   :  { %v554_v1 = vadd.f32 %v2294_v41, %v553_v18 }
 0x258   :  { %v633_v4 = vmax.f32 %v559_v59, 0.0 }
 0x259   :  { %v632_v5 = vmax.f32 %v554_v1, 0.0  ;;  %v1659_v40 = vpop.f32.mrb[2].mxu1 }
 0x25a   :  { %v649_v39 = vmul.f32 %v633_v4, %v2058_v27  ;;  %v569_v11 = vadd.f32 %v1659_v40, %v2294_v41  ;;  %v563_v53 = vpop.f32.mrb[3].mxu1 }
 0x25b   :  { %v648_v54 = vmul.f32 %v632_v5, %v2042_v21  ;;  %v564_v37 = vadd.f32 %v2294_v41, %v563_v53 }
 0x25c   :  { %v635_v34 = vmax.f32 %v569_v11, 0.0 }
 0x25d   :  { %v634_v32 = vmax.f32 %v564_v37, 0.0  ;;  %v1662_v31 = vpop.f32.mrb[4].mxu1  ;;  %v1823_v29 = vpack.c.bf16 %v649_v39, %v648_v54 }
 0x25e   :  { %v651_v55 = vmul.f32 %v635_v34, %v2056_v26  ;;  %v579_v18 = vadd.f32 %v1662_v31, %v2294_v41  ;;  %v573_v59 = vpop.f32.mrb[5].mxu1 }
 0x25f   :  { %v650_v1 = vmul.f32 %v634_v32, %v2040_v20  ;;  %v574_v27 = vadd.f32 %v2294_v41, %v573_v59  ;;  %1824 = vmatprep.subr.bf16.mxu1 %v1823_v29 }
 0x260   :  { %v637_v40 = vmax.f32 %v579_v18, 0.0  ;;  %1826 = vmatpush3.bf16.msra.mxu1 %v1823_v29 }
 0x261   :  { %v636_v4 = vmax.f32 %v574_v27, 0.0  ;;  %v1665_v21 = vpop.f32.mrb[6].mxu1  ;;  %v1827_v5 = vpack.c.bf16 %v651_v55, %v650_v1 }
 0x262   :  { %v653_v11 = vmul.f32 %v637_v40, %v2070_v35  ;;  %v589_v37 = vadd.f32 %v1665_v21, %v2294_v41  ;;  %v583_v39 = vpop.f32.mrb[7].mxu1 }
 0x263   :  { %v652_v26 = vmul.f32 %v636_v4, %v2072_v36  ;;  %v584_v31 = vadd.f32 %v2294_v41, %v583_v39  ;;  %1828 = vmatprep.subr.bf16.mxu1 %v1827_v5 }
 0x264   :  { %v639_v34 = vmax.f32 %v589_v37, 0.0  ;;  %1830 = vmatpush3.bf16.msra.mxu1 %v1827_v5 }
 0x265   :  { %v638_v20 = vmax.f32 %v584_v31, 0.0  ;;  %v1668_v32 = vpop.f32.mrb[8].mxu1  ;;  %v1831_v53 = vpack.c.bf16 %v653_v11, %v652_v26 }
 0x266   :  { %v655_v29 = vmul.f32 %v639_v34, %v2082_v42  ;;  %v599_v54 = vadd.f32 %v1668_v32, %v2294_v41  ;;  %v593_v55 = vpop.f32.mrb[9].mxu1 }
 0x267   :  { %v654_v35 = vmul.f32 %v638_v20, %v2084_v43  ;;  %v594_v18 = vadd.f32 %v2294_v41, %v593_v55  ;;  %1832 = vmatprep.subr.bf16.mxu1 %v1831_v53 }
 0x268   :  { %v641_v59 = vmax.f32 %v599_v54, 0.0  ;;  %1834 = vmatpush3.bf16.msra.mxu1 %v1831_v53 }
 0x269   :  { %v640_v36 = vmax.f32 %v594_v18, 0.0  ;;  %v1671_v1 = vpop.f32.mrb[10].mxu1  ;;  %v1835_v27 = vpack.c.bf16 %v655_v29, %v654_v35 }
 0x26a   :  { %v657_v40 = vmul.f32 %v641_v59, %v2094_v49  ;;  %v609_v4 = vadd.f32 %v1671_v1, %v2294_v41  ;;  %v603_v21 = vpop.f32.mrb[11].mxu1 }
 0x26b   :  { %v656_v42 = vmul.f32 %v640_v36, %v2096_v50  ;;  %v604_v5 = vadd.f32 %v2294_v41, %v603_v21  ;;  %1836 = vmatprep.subr.bf16.mxu1 %v1835_v27 }
 0x26c   :  { %v643_v11 = vmax.f32 %v609_v4, 0.0  ;;  %1838 = vmatpush3.bf16.msra.mxu1 %v1835_v27 }
 0x26d   :  { %v642_v43 = vmax.f32 %v604_v5, 0.0  ;;  %v1674_v37 = vpop.f32.mrb[12].mxu1  ;;  %v1839_v39 = vpack.c.bf16 %v657_v40, %v656_v42 }
 0x26e   :  { %v659_v26 = vmul.f32 %v643_v11, %v2106_v56  ;;  %v619_v31 = vadd.f32 %v1674_v37, %v2294_v41  ;;  %v613_v34 = vpop.f32.mrb[13].mxu1 }
 0x26f   :  { %v658_v49 = vmul.f32 %v642_v43, %v2108_v57  ;;  %v614_v20 = vadd.f32 %v2294_v41, %v613_v34  ;;  %1840 = vmatprep.subr.bf16.mxu1 %v1839_v39 }
 0x270   :  { %v645_v32 = vmax.f32 %v619_v31, 0.0  ;;  %1842 = vmatpush3.bf16.msra.mxu1 %v1839_v39 }
 0x271   :  { %v644_v50 = vmax.f32 %v614_v20, 0.0  ;;  %v1677_v53 = vpop.f32.mrb[14].mxu1  ;;  %v1843_v29 = vpack.c.bf16 %v659_v26, %v658_v49  ;;  %v1910_v26 = vmov 0.0|0.0   ;;  %v1912_v49 = vmov 0.0   ;;  %v2410_v20 = vld [vmem:[%s2501_s6] ss:$0 sm:$0xff] }
 0x272   :  { %v661_v54 = vmul.f32 %v645_v32, %v2118_v63  ;;  %v629_v55 = vadd.f32 %v1677_v53, %v2294_v41  ;;  %v623_v35 = vpop.f32.mrb[15].mxu1  ;;  %v2518_v63 = vunpack.c.h.bf16 %v2168_v25 }
 0x273   :  { %v660_v56 = vmul.f32 %v644_v50, %v2120_v0  ;;  %v624_v18 = vadd.f32 %v2294_v41, %v623_v35  ;;  %1844 = vmatprep.subr.bf16.mxu1 %v1843_v29  ;;  %v2519_v0 = vunpack.c.l.bf16 %v2179_v30 }
 0x274   :  { %v647_v59 = vmax.f32 %v629_v55, 0.0  ;;  %1846 = vmatpush3.bf16.msra.mxu1 %v1843_v29 }
 0x275   :  { %v646_v57 = vmax.f32 %v624_v18, 0.0  ;;  %v1847_v36 = vpack.c.bf16 %v661_v54, %v660_v56 }
 0x276   :  { %v663_v1 = vmul.f32 %v647_v59, %v2130_v6  ;;  %v2520_v6 = vunpack.c.h.bf16 %v2179_v30 }
 0x277   :  { %v662_v27 = vmul.f32 %v646_v57, %v2132_v7  ;;  %1848 = vmatprep.subr.bf16.mxu1 %v1847_v36  ;;  %v2521_v7 = vunpack.c.l.bf16 %v2190_v33 }
 0x278   :  { %1850 = vmatpush3.bf16.msra.mxu1 %v1847_v36 }
 0x279   :  { %v1851_v40 = vpack.c.bf16 %v663_v1, %v662_v27 }
 0x27b   :  { %1852 = vmatprep.subr.bf16.mxu1 %v1851_v40 }
 0x27c   :  { %1854 = vmatpush3.bf16.msra.mxu1 %v1851_v40 }
 0x27d   :  { %1859 = vmatprep.subr.bf16.mxu1 %v1910_v26 }
 0x27f   :  { %1711 = vmatmul.mubr.f32.vlgmr.msra.gmra.mrb[16].mxu1 %v1448_v13  ;;  %v2523_v13 = vunpack.c.l.bf16 %v2201_v38 }
 0x280   :  { %1713 = vmatprep.mubr.f32.mxu1 %v1451_v14  ;;  %v2524_v14 = vunpack.c.h.bf16 %v2201_v38 }
 0x283   :  { %1714 = vmatmul.mubr.f32.gmra.mrb[18].mxu1 %v1452_v16 }
 0x284   :  { %1716 = vmatprep.mubr.f32.mxu1 %v1455_v19 }
 0x287   :  { %1717 = vmatmul.mubr.f32.gmra.mrb[20].mxu1 %v1456_v23 }
 0x288   :  { %1719 = vmatprep.mubr.f32.mxu1 %v1459_v24 }
 0x28b   :  { %1720 = vmatmul.mubr.f32.gmra.mrb[22].mxu1 %v1460_v28 }
 0x28c   :  { %1722 = vmatprep.mubr.f32.mxu1 %v2517_v17 }
 0x28f   :  { %1723 = vmatmul.mubr.f32.gmra.mrb[24].mxu1 %v2518_v63 }
 0x290   :  { %1725 = vmatprep.mubr.f32.mxu1 %v2519_v0 }
 0x293   :  { %1726 = vmatmul.mubr.f32.gmra.mrb[26].mxu1 %v2520_v6 }
 0x294   :  { %1728 = vmatprep.mubr.f32.mxu1 %v2521_v7 }
 0x297   :  { %1729 = vmatmul.mubr.f32.gmra.mrb[28].mxu1 %v2522_v12 }
 0x298   :  { %1731 = vmatprep.mubr.f32.mxu1 %v2523_v13 }
 0x29b   :  { %1732 = vmatmul.mubr.f32.gmra.mrb[30].mxu1 %v2524_v14 }
 0x29c   :  { %1770 = vmatprep.mubr.msk.f32.mxu1 %vm1911_vm2, %v1912_v49 }
 0x352   :  { %v1712_v15 = vpop.f32.mrb[16].mxu1 }
 0x353   :  { %v730_v16 = vpop.f32.mrb[17].mxu1  ;;  %v810_v22 = vmul.f32 %v1712_v15, %v2219_v45 }
 0x354   :  { %v809_v19 = vmul.f32 %v730_v16, %v2221_v46 }
 0x356   :  { %v1715_v23 = vpop.f32.mrb[18].mxu1  ;;  %1738 = vmatprep.mubr.msk.f32.mxu0 %vm834_vm1, %v809_v19 }
 0x357   :  { %v740_v24 = vpop.f32.mrb[19].mxu1  ;;  %1739 = vmatmul.mubr.msk.f32.vlgmr.msra.gmra.mrb[16].mxu0 %vm834_vm1, %v810_v22  ;;  %v812_v28 = vmul.f32 %v1715_v23, %v2225_v48 }
 0x358   :  { %v811_v25 = vmul.f32 %v740_v24, %v2223_v47 }
 0x35a   :  { %v1718_v30 = vpop.f32.mrb[20].mxu1  ;;  %1741 = vmatprep.mubr.msk.f32.mxu0 %vm834_vm1, %v811_v25 }
 0x35b   :  { %v750_v33 = vpop.f32.mrb[21].mxu1  ;;  %1742 = vmatmul.mubr.msk.f32.gmra.mrb[18].mxu0 %vm834_vm1, %v812_v28  ;;  %v814_v45 = vmul.f32 %v1718_v30, %v2229_v52 }
 0x35c   :  { %v813_v38 = vmul.f32 %v750_v33, %v2227_v51 }
 0x35e   :  { %v1721_v46 = vpop.f32.mrb[22].mxu1  ;;  %1744 = vmatprep.mubr.msk.f32.mxu0 %vm834_vm1, %v813_v38 }
 0x35f   :  { %v760_v41 = vpop.f32.mrb[23].mxu1  ;;  %1745 = vmatmul.mubr.msk.f32.gmra.mrb[20].mxu0 %vm834_vm1, %v814_v45  ;;  %v816_v48 = vmul.f32 %v1721_v46, %v2237_v62 }
 0x360   :  { %v815_v47 = vmul.f32 %v760_v41, %v2234_v60 }
 0x362   :  { %v1724_v4 = vpop.f32.mrb[24].mxu1  ;;  %1747 = vmatprep.mubr.msk.f32.mxu0 %vm834_vm1, %v815_v47 }
 0x363   :  { %v770_v21 = vpop.f32.mrb[25].mxu1  ;;  %1748 = vmatmul.mubr.msk.f32.gmra.mrb[22].mxu0 %vm834_vm1, %v816_v48  ;;  %v818_v52 = vmul.f32 %v1724_v4, %v2247_v10 }
 0x364   :  { %v817_v51 = vmul.f32 %v770_v21, %v2244_v8 }
 0x366   :  { %v1727_v42 = vpop.f32.mrb[26].mxu1  ;;  %1750 = vmatprep.mubr.msk.f32.mxu0 %vm834_vm1, %v817_v51 }
 0x367   :  { %v780_v5 = vpop.f32.mrb[27].mxu1  ;;  %1751 = vmatmul.mubr.msk.f32.gmra.mrb[24].mxu0 %vm834_vm1, %v818_v52  ;;  %v820_v62 = vmul.f32 %v1727_v42, %v2257_v61 }
 0x368   :  { %v819_v60 = vmul.f32 %v780_v5, %v2254_v58 }
 0x36a   :  { %v1730_v11 = vpop.f32.mrb[28].mxu1  ;;  %1753 = vmatprep.mubr.msk.f32.mxu0 %vm834_vm1, %v819_v60 }
 0x36b   :  { %v790_v43 = vpop.f32.mrb[29].mxu1  ;;  %1754 = vmatmul.mubr.msk.f32.gmra.mrb[26].mxu0 %vm834_vm1, %v820_v62  ;;  %v822_v10 = vmul.f32 %v1730_v11, %v2267_v44  ;;  %v1118_v44 = vld [vmem:[%s2502_s7 + $0x8] sm:$0xff] }
 0x36c   :  { %v821_v8 = vmul.f32 %v790_v43, %v2264_v9  ;;  %v1117_v9 = vld [vmem:[%s2502_s7] sm:$0xff] }
 0x36d   :  { %v1860_v31 = vpack.c.bf16 %v1118_v44, %v1117_v9 }
 0x36e   :  { %v1733_v37 = vpop.f32.mrb[30].mxu1  ;;  %1756 = vmatprep.mubr.msk.f32.mxu0 %vm834_vm1, %v821_v8 }
 0x36f   :  { %v800_v39 = vpop.f32.mrb[31].mxu1  ;;  %1757 = vmatmul.mubr.msk.f32.gmra.mrb[28].mxu0 %vm834_vm1, %v822_v10  ;;  %v824_v61 = vmul.f32 %v1733_v37, %v2277_v3  ;;  %1861 = vmatpush3.bf16.msra.mxu1 %v1860_v31  ;;  %v1120_v3 = vld [vmem:[%s2502_s7 + $0x18] sm:$0xff] }
 0x370   :  { %v823_v58 = vmul.f32 %v800_v39, %v2274_v2  ;;  %1862 = vmatprep.subr.bf16.mxu1 %v1910_v26  ;;  %v1119_v2 = vld [vmem:[%s2502_s7 + $0x10] sm:$0xff] }
 0x371   :  { %v1863_v34 = vpack.c.bf16 %v1120_v3, %v1119_v2 }
 0x372   :  { %1759 = vmatprep.mubr.msk.f32.mxu0 %vm834_vm1, %v823_v58 }
 0x373   :  { %1760 = vmatmul.mubr.msk.f32.gmra.mrb[30].mxu0 %vm834_vm1, %v824_v61  ;;  %1864 = vmatpush3.bf16.msra.mxu1 %v1863_v34 }
 0x374   :  { %1865 = vmatprep.subr.bf16.mxu1 %v1910_v26 }
 0x42a   :  { %v1740_v32 = vpop.f32.mrb[16].mxu0 }
 0x42b   :  { %v955_v50 = vadd.f32 %v1740_v32, %v2410_v20  ;;  %v949_v53 = vpop.f32.mrb[17].mxu0 }
 0x42c   :  { %v950_v29 = vadd.f32 %v2410_v20, %v949_v53 }
 0x42d   :  { %v1029_v54 = vmax.f32 %v955_v50, 0.0 }
 0x42e   :  { %v1028_v55 = vmax.f32 %v950_v29, 0.0  ;;  %v1743_v35 = vpop.f32.mrb[18].mxu0 }
 0x42f   :  { %v1046_v56 = vsel %vm1044_vm3, %v1029_v54, 0.0  ;;  %v965_v18 = vadd.f32 %v1743_v35, %v2410_v20  ;;  %v959_v59 = vpop.f32.mrb[19].mxu0 }
 0x430   :  { %v1045_v57 = vsel %vm1044_vm3, %v1028_v55, 0.0  ;;  %v960_v36 = vadd.f32 %v2410_v20, %v959_v59 }
 0x431   :  { %v1047_v1 = vadd.f32 %v1046_v56, %v1045_v57  ;;  %v1031_v27 = vmax.f32 %v965_v18, 0.0 }
 0x432   :  { %v1030_v40 = vmax.f32 %v960_v36, 0.0  ;;  %v1746_v17 = vpop.f32.mrb[20].mxu0 }
 0x433   :  { %v1048_v63 = vrot.slane %v1047_v1, 4  ;;  %v1055_v0 = vsel %vm1044_vm3, %v1031_v27, 0.0  ;;  %v975_v6 = vadd.f32 %v1746_v17, %v2410_v20  ;;  %v969_v7 = vpop.f32.mrb[21].mxu0 }
 0x434   :  { %v1054_v12 = vsel %vm1044_vm3, %v1030_v40, 0.0  ;;  %v970_v13 = vadd.f32 %v2410_v20, %v969_v7 }
 0x435   :  { %v1049_v14 = vadd.f32 %v1048_v63, %v1047_v1  ;;  %v1056_v15 = vadd.f32 %v1055_v0, %v1054_v12  ;;  %v1033_v16 = vmax.f32 %v975_v6, 0.0 }
 0x436   :  { %v1032_v19 = vmax.f32 %v970_v13, 0.0  ;;  %v1749_v22 = vpop.f32.mrb[22].mxu0 }
 0x437   :  { %v1050_v23 = vrot.slane %v1049_v14, 2  ;;  %v1057_v24 = vrot.slane %v1056_v15, 4  ;;  %v1064_v25 = vsel %vm1044_vm3, %v1033_v16, 0.0  ;;  %v985_v28 = vadd.f32 %v1749_v22, %v2410_v20  ;;  %v979_v30 = vpop.f32.mrb[23].mxu0 }
 0x438   :  { %v1063_v33 = vsel %vm1044_vm3, %v1032_v19, 0.0  ;;  %v980_v38 = vadd.f32 %v2410_v20, %v979_v30 }
 0x439   :  { %v1051_v45 = vadd.f32 %v1050_v23, %v1049_v14  ;;  %v1058_v46 = vadd.f32 %v1057_v24, %v1056_v15  ;;  %v1065_v41 = vadd.f32 %v1064_v25, %v1063_v33  ;;  %v1035_v47 = vmax.f32 %v985_v28, 0.0 }
 0x43a   :  { %v1034_v48 = vmax.f32 %v980_v38, 0.0  ;;  %v1752_v4 = vpop.f32.mrb[24].mxu0 }
 0x43b   :  { %v1059_v21 = vrot.slane %v1058_v46, 2  ;;  %v1066_v51 = vrot.slane %v1065_v41, 4  ;;  %v1073_v52 = vsel %vm1044_vm3, %v1035_v47, 0.0  ;;  %v989_v42 = vpop.f32.mrb[25].mxu0  ;;  %v1052_v5 = vrot.slane %v1051_v45, 1 }
 0x43c   :  { %v1072_v60 = vsel %vm1044_vm3, %v1034_v48, 0.0  ;;  %v995_v62 = vadd.f32 %v1752_v4, %v2410_v20  ;;  %v990_v11 = vadd.f32 %v2410_v20, %v989_v42 }
 0x43d   :  { %v1060_v43 = vadd.f32 %v1059_v21, %v1058_v46  ;;  %v1067_v8 = vadd.f32 %v1066_v51, %v1065_v41  ;;  %v1074_v10 = vadd.f32 %v1073_v52, %v1072_v60  ;;  %v1053_v3 = vadd.f32 %v1052_v5, %v1051_v45 }
 0x43e   :  { %v1037_v37 = vmax.f32 %v995_v62, 0.0  ;;  %v1036_v39 = vmax.f32 %v990_v11, 0.0  ;;  %v1755_v58 = vpop.f32.mrb[26].mxu0 }
 0x43f   :  { %v1061_v61 = vrot.slane %v1060_v43, 1  ;;  %v1068_v9 = vrot.slane %v1067_v8, 2  ;;  %v1075_v44 = vrot.slane %v1074_v10, 4  ;;  %v1005_v31 = vadd.f32 %v1755_v58, %v2410_v20  ;;  %v999_v2 = vpop.f32.mrb[27].mxu0 }
 0x440   :  { %v1082_v34 = vsel %vm1044_vm3, %v1037_v37, 0.0  ;;  %v1081_v32 = vsel %vm1044_vm3, %v1036_v39, 0.0  ;;  %v1000_v50 = vadd.f32 %v2410_v20, %v999_v2 }
 0x441   :  { %v1062_v53 = vadd.f32 %v1061_v61, %v1060_v43  ;;  %v1069_v29 = vadd.f32 %v1068_v9, %v1067_v8  ;;  %v1076_v54 = vadd.f32 %v1075_v44, %v1074_v10  ;;  %v1083_v55 = vadd.f32 %v1082_v34, %v1081_v32  ;;  %v1223_v32 = vld [vmem:[%s2504_s9] sm:$0xff] }
 0x442   :  { %v1039_v35 = vmax.f32 %v1005_v31, 0.0  ;;  %v1038_v56 = vmax.f32 %v1000_v50, 0.0  ;;  %v1758_v18 = vpop.f32.mrb[28].mxu0  ;;  %v1224_v50 = vld [vmem:[%s2504_s9 + $0x8] sm:$0xff] }
 0x443   :  { %v1137_v59 = vsel %vm1136_vm4, %v1062_v53, %v1053_v3  ;;  %v1070_v57 = vrot.slane %v1069_v29, 1  ;;  %v1077_v36 = vrot.slane %v1076_v54, 2  ;;  %v1084_v1 = vrot.slane %v1083_v55, 4  ;;  %v1009_v27 = vpop.f32.mrb[29].mxu0 }
 0x444   :  { %v1091_v40 = vsel %vm1044_vm3, %v1039_v35, 0.0  ;;  %v1090_v17 = vsel %vm1044_vm3, %v1038_v56, 0.0  ;;  %v1015_v63 = vadd.f32 %v1758_v18, %v2410_v20  ;;  %v1010_v0 = vadd.f32 %v2410_v20, %v1009_v27  ;;  %v1225_v56 = vld [vmem:[%s2504_s9 + $0x10] sm:$0xff]  ;;  %v1226_v18 = vld [vmem:[%s2504_s9 + $0x18] sm:$0xff] }
 0x445   :  { %v1071_v6 = vadd.f32 %v1070_v57, %v1069_v29  ;;  %v1078_v7 = vadd.f32 %v1077_v36, %v1076_v54  ;;  %v1085_v12 = vadd.f32 %v1084_v1, %v1083_v55  ;;  %v1092_v13 = vadd.f32 %v1091_v40, %v1090_v17  ;;  %v1439_v57 = vld [vmem:[%s2503_s8] ss:$0 sm:$0xff] }
 0x446   :  { %v1041_v14 = vmax.f32 %v1015_v63, 0.0  ;;  %v1040_v15 = vmax.f32 %v1010_v0, 0.0  ;;  %v1761_v16 = vpop.f32.mrb[30].mxu0  ;;  %v1866_v55 = vpack.c.bf16 %v1224_v50, %v1223_v32  ;;  %v1308_v17 = vld [vmem:[%s2506_s11] sm:$0xff] }
 0x447   :  { %v1139_v19 = vsel %vm1138_vm5, %v1071_v6, %v1137_v59  ;;  %v1079_v22 = vrot.slane %v1078_v7, 1  ;;  %v1086_v23 = vrot.slane %v1085_v12, 2  ;;  %v1093_v24 = vrot.slane %v1092_v13, 4  ;;  %v1019_v25 = vpop.f32.mrb[31].mxu0  ;;  %v1441_v0 = vld [vmem:[%s2505_s10] ss:$0 sm:$0xff] }
 0x448   :  { %v1100_v28 = vsel %vm1044_vm3, %v1041_v14, 0.0  ;;  %v1099_v30 = vsel %vm1044_vm3, %v1040_v15, 0.0  ;;  %v1025_v33 = vadd.f32 %v1761_v16, %v2410_v20  ;;  %v1020_v38 = vadd.f32 %v2410_v20, %v1019_v25 }
 0x449   :  { %v1080_v45 = vadd.f32 %v1079_v22, %v1078_v7  ;;  %v1087_v46 = vadd.f32 %v1086_v23, %v1085_v12  ;;  %v1094_v41 = vadd.f32 %v1093_v24, %v1092_v13  ;;  %v1101_v47 = vadd.f32 %v1100_v28, %v1099_v30 }
 0x44a   :  { %v1043_v48 = vmax.f32 %v1025_v33, 0.0  ;;  %v1042_v4 = vmax.f32 %v1020_v38, 0.0  ;;  %v1869_v59 = vpack.c.bf16 %v1226_v18, %v1225_v56 }
 0x44b   :  { %v1141_v21 = vsel %vm1140_vm6, %v1080_v45, %v1139_v19  ;;  %v1088_v51 = vrot.slane %v1087_v46, 1  ;;  %v1095_v52 = vrot.slane %v1094_v41, 2  ;;  %v1102_v42 = vrot.slane %v1101_v47, 4 }
 0x44c   :  { %v1109_v5 = vsel %vm1044_vm3, %v1043_v48, 0.0  ;;  %v1108_v60 = vsel %vm1044_vm3, %v1042_v4, 0.0 }
 0x44d   :  { %v1089_v62 = vadd.f32 %v1088_v51, %v1087_v46  ;;  %v1096_v11 = vadd.f32 %v1095_v52, %v1094_v41  ;;  %v1103_v43 = vadd.f32 %v1102_v42, %v1101_v47  ;;  %v1110_v20 = vadd.f32 %v1109_v5, %v1108_v60 }
 0x44f   :  { %v1143_v8 = vsel %vm1142_vm7, %v1089_v62, %v1141_v21  ;;  %v1097_v10 = vrot.slane %v1096_v11, 1  ;;  %v1104_v37 = vrot.slane %v1103_v43, 2  ;;  %v1111_v39 = vrot.slane %v1110_v20, 4 }
 0x451   :  { %v1098_v58 = vadd.f32 %v1097_v10, %v1096_v11  ;;  %v1105_v61 = vadd.f32 %v1104_v37, %v1103_v43  ;;  %v1112_v9 = vadd.f32 %v1111_v39, %v1110_v20 }
 0x453   :  { %v1106_v44 = vrot.slane %v1105_v61, 1  ;;  %v1113_v31 = vrot.slane %v1112_v9, 2  ;;  %v1145_v2 = vsel %vm1144_vm8, %v1098_v58, %v1143_v8 }
 0x455   :  { %v1107_v3 = vadd.f32 %v1106_v44, %v1105_v61  ;;  %v1114_v34 = vadd.f32 %v1113_v31, %v1112_v9 }
 0x457   :  { %v1115_v53 = vrot.slane %v1114_v34, 1  ;;  %v1147_v29 = vsel %vm1146_vm9, %v1107_v3, %v1145_v2 }
 0x459   :  { %v1116_v54 = vadd.f32 %v1115_v53, %v1114_v34 }
 0x45b   :  { %v1149_v35 = vsel %vm1148_vm10, %v1116_v54, %v1147_v29 }
 0x45c   :  { %1771 = vmatmul.mubr.msk.f32.vlgmr.msra.gmra.mrb[32].mxu1 %vm1044_vm3, %v1149_v35 }
 0x45d   :  { %1867 = vmatpush3.bf16.msra.mxu1 %v1866_v55  ;;  %1781 = vmatprep.mubr.msk.f32.mxu1 %vm1911_vm2, %v1912_v49 }
 0x45e   :  { %1868 = vmatprep.subr.bf16.mxu1 %v1910_v26 }
 0x461   :  { %1870 = vmatpush3.bf16.msra.mxu1 %v1869_v59 }
 0x462   :  { %1871 = vmatprep.subr.bf16.mxu1 %v1910_v26  ;;  %v1309_v26 = vld [vmem:[%s2506_s11 + $0x8] sm:$0xff]  ;;  %s1884_s11 = scalar_lea.vmem %s1398_s22, 128 }
 0x463   :  { %v1872_v63 = vpack.c.bf16 %v1309_v26, %v1308_v17  ;;  %p1885_p0 = scmp.ne.s32.totalorder %s1398_s22, %s1884_s11  ;;  %p1890_p2 = scmp.lt.s32.totalorder %s1884_s11, %s1884_s11 }
 0x465   :  { %p1891_p3 = por %p1890_p2, %p1889_p1 }
 0x467   :  { %p1892_p4 = pnand %p1891_p3, %p1885_p0 }
 0x52f   :  { %v1218_v36 = vpop.f32.mrb[32].mxu1 }
 0x530   :  { %v1219_v1 = vadd.f32 %v1439_v57, %v1218_v36  ;;  %v1772_v27 = vpop.f32.mrb[33].mxu1 }
 0x532   :  { %v1222_v40 = vmax.f32 %v1219_v1, 0.0 }
 0x534   :  { %1782 = vmatmul.mubr.msk.f32.vlgmr.msra.gmra.mrb[34].mxu1 %vm1044_vm3, %v1222_v40 }
 0x535   :  { %1788 = vmatprep.mubr.msk.f32.mxu1 %vm1911_vm2, %v1912_v49  ;;  %1873 = vmatpush3.bf16.msra.mxu1 %v1872_v63  ;;  %v1443_v49 = vld [vmem:[%s2507_s12] ss:$0 sm:$0xff] }
 0x607   :  { %v1303_v6 = vpop.f32.mrb[34].mxu1 }
 0x608   :  { %v1304_v7 = vadd.f32 %v1441_v0, %v1303_v6  ;;  %v1783_v12 = vpop.f32.mrb[35].mxu1 }
 0x60a   :  { %v1307_v13 = vmax.f32 %v1304_v7, 0.0 }
 0x60c   :  { %1789 = vmatmul.mubr.msk.f32.vlgmr.msra.gmra.mrb[36].mxu1 %vm834_vm1, %v1307_v13 }
 0x6df   :  { %v1386_v14 = vpop.f32.mrb[36].mxu1 }
 0x6e0   :  { %v1387_v15 = vadd.f32 %v1443_v49, %v1386_v14  ;;  %v1790_v16 = vpop.f32.mrb[37].mxu1 }
 0x6e2   :  { %1390 = vst [vmem:[#allocation2] sm:$0xff] %v1387_v15 }
 0x6e3   :  { %1895 = shalt.err (!%p1892_p4)
}
 0x6e4   :  { %s1896_s23 = scalar_lea.hbm %s2508_s13, 128 }
 0x6e5   :  { %p1897_p5 = scmp.ne.s32.totalorder %s2508_s13, %s1896_s23  ;;  %p1900_p6 = scmp.lt.u32.totalorder %s1896_s23, %s2508_s13 }
 0x6e7   :  { %p1902_p7 = pnand %p1900_p6, %p1897_p5 }
 0x6e9   :  { %1905 = shalt.err (!%p1902_p7)
}
 0x6ea   :  { %1400 = dma.vmem_to_hbm [thread:$0]  %s1398_s22, 128, %s2508_s13, [#allocation3]  }
 0x6eb   :  { %1906 = dma.done.wait [#allocation3], 128  }
 0x6ec   :  { %1907 = vsyncadd [#allocation3], 4294967168 }
 0x6ed   :  { %1404 = vsyncpa [#allocation3], 1 }

</bundles_post_ra>
